<compile_context>
chip_gen: v7x
topology: tpu7x:2x2x1
jax: 0.10.0
libtpu: 0.0.40
codegen_flags: <defaults>
</compile_context>

<pallas_src>
import jax
import jax.numpy as jnp
from jax.experimental import pallas as pl
from jax.experimental.pallas import tpu as pltpu

F = 14          # feature size of every Linear layer
N_HIDDEN = 6    # number of (fc, bn, relu) blocks
BN_EPS = 1e-5

_SUBLANE = 8
_F_PADDED = ((F + _SUBLANE - 1) // _SUBLANE) * _SUBLANE        # 14 -> 16 sublanes for f32
_LIVE_ACT_BUFFERS = 6                                          # input, act, matmul out, temps, output
_BYTES_PER_COL = _LIVE_ACT_BUFFERS * _F_PADDED * 4             # VMEM bytes per flattened-batch column


def _vmem_budget_bytes() -> int:
    """Per-generation VMEM budget with 25% headroom (conservative 64 MiB v7x fallback)."""
    cap = 64 << 20
    try:
        cap = int(getattr(pltpu.get_tpu_info(), "vmem_capacity_bytes", cap))
    except Exception:
        pass
    return (3 * cap) // 4


def _fcnet_kernel(x_ref, w_ref, gamma_ref, beta_ref, wout_ref, bias_ref, o_ref):
    """Whole FcNet forward on a VMEM-resident, lane-dense (F, N) tile.

    x_ref     : (F, N)      input activations, features on sublanes, batch on lanes
    w_ref     : (6, F, F)   hidden Linear weights in PyTorch (out, in) layout
    gamma_ref : (6, F, 1)   BatchNorm scale
    beta_ref  : (6, F, 1)   BatchNorm shift
    wout_ref  : (F, F)      output Linear weight, (out, in) layout
    bias_ref  : (F, 1)      output Linear bias
    o_ref     : (F, N)      output
    """
    x = x_ref[...]
    inv_n = 1.0 / x.shape[1]

    for layer in range(N_HIDDEN):
        # Linear (no bias): h = W @ x -> (14, N).  PyTorch (out, in) layout needs no transpose.
        x = jnp.dot(w_ref[layer], x, preferred_element_type=jnp.float32)

        # BatchNorm1d (training-mode batch stats over N) folded with ReLU:
        # one reduction pass for sum / sumsq, one fused scale*x + shift + ReLU pass.
        s1 = jnp.sum(x, axis=1, keepdims=True)                     # (F, 1)
        s2 = jnp.sum(x * x, axis=1, keepdims=True)                 # (F, 1)
        mean = s1 * inv_n
        var = s2 * inv_n - mean * mean                             # biased variance (f32 accum)
        scale = gamma_ref[layer] * jax.lax.rsqrt(var + BN_EPS)     # rsqrt on the EUP
        shift = beta_ref[layer] - mean * scale
        x = jnp.maximum(x * scale + shift, 0.0)

    # Final Linear with bias.
    o_ref[...] = (jnp.dot(wout_ref[...], x, preferred_element_type=jnp.float32)
                  + bias_ref[...])


@jax.jit
def fcnet_forward(x, w_hidden, gamma, beta, w_out, bias):
    """x: (images, patches, F) float32 -> (images, patches, F) float32."""
    images, patches, values = x.shape
    assert values == F
    n = images * patches

    # VMEM plan: whole flattened batch resident, ~64 B/column amortized in (F, N) layout.
    # TODO(synk): add a gridded two-phase-BN path (per-N-tile partial sum/sumsq, then
    # normalize) for batches larger than the VMEM budget and to split across v7x's 2 TCs.
    budget = _vmem_budget_bytes()
    footprint = _BYTES_PER_COL * n + (64 << 10)  # + parameters & slack
    assert footprint <= budget, (
        f"flattened batch N={n} needs ~{footprint} B of VMEM, budget is {budget} B")

    # Lane-dense activations: features (14) on sublanes, N on lanes (wrapper-side plumbing).
    x_t = x.reshape(n, F).T                                        # (F, N)
    gamma3 = gamma.reshape(N_HIDDEN, F, 1)
    beta3 = beta.reshape(N_HIDDEN, F, 1)
    bias2 = bias.reshape(F, 1)

    vmem = pl.BlockSpec(memory_space=pltpu.MemorySpace.VMEM)
    out_t = pl.pallas_call(
        _fcnet_kernel,
        out_shape=jax.ShapeDtypeStruct((F, n), jnp.float32),
        in_specs=[vmem, vmem, vmem, vmem, vmem, vmem],
        out_specs=vmem,
        compiler_params=pltpu.CompilerParams(vmem_limit_bytes=budget),
    )(x_t, w_hidden, gamma3, beta3, w_out, bias2)

    return out_t.T.reshape(images, patches, F)


def init_params(key):
    """Deterministic parameter init mirroring PyTorch defaults."""
    keys = jax.random.split(key, N_HIDDEN + 2)
    bound = 1.0 / jnp.sqrt(jnp.float32(F))  # kaiming-uniform-style bound for Linear

    w_hidden = jnp.stack([
        jax.random.uniform(keys[i], (F, F), jnp.float32, -bound, bound)
        for i in range(N_HIDDEN)
    ])                                                     # (6, F, F) as (out, in)
    gamma = jnp.ones((N_HIDDEN, F), jnp.float32)           # BN weight default
    beta = jnp.zeros((N_HIDDEN, F), jnp.float32)           # BN bias default
    w_out = jax.random.uniform(keys[N_HIDDEN], (F, F), jnp.float32, -bound, bound)
    bias = jax.random.uniform(keys[N_HIDDEN + 1], (F,), jnp.float32, -bound, bound)
    return w_hidden, gamma, beta, w_out, bias


def reference_forward(x, w_hidden, gamma, beta, w_out, bias):
    """Pure-JAX reference implementing the PyTorch forward (training-mode BN)."""
    images, patches, _ = x.shape
    h = x.reshape(images * patches, F)
    for layer in range(N_HIDDEN):
        h = h @ w_hidden[layer].T
        mean = jnp.mean(h, axis=0, keepdims=True)
        var = jnp.mean((h - mean) ** 2, axis=0, keepdims=True)
        h = (h - mean) / jnp.sqrt(var + BN_EPS)
        h = h * gamma[layer][None, :] + beta[layer][None, :]
        h = jnp.maximum(h, 0.0)
    h = h @ w_out.T + bias[None, :]
    return h.reshape(images, patches, F)


if __name__ == "__main__":
    key = jax.random.PRNGKey(0)
    kx, kp = jax.random.split(key)

    images, patches = 2, 8
    x = jax.random.normal(kx, (images, patches, F), jnp.float32)
    params = init_params(kp)

    out = jax.block_until_ready(fcnet_forward(x, *params))
    ref = reference_forward(x, *params)

    assert out.shape == (images, patches, F)
    assert jnp.allclose(out, ref, atol=1e-4, rtol=1e-4), "mismatch vs JAX reference"

    print("KERNEL_OK")
</pallas_src>

<mosaic_0001>
module attributes {stable_mosaic.version = 11 : i64} {
  func.func @_fcnet_kernel(%arg0: memref<14x16xf32, #tpu.memory_space<vmem>>, %arg1: memref<6x14x14xf32, #tpu.memory_space<vmem>>, %arg2: memref<6x14x1xf32, #tpu.memory_space<vmem>>, %arg3: memref<6x14x1xf32, #tpu.memory_space<vmem>>, %arg4: memref<14x14xf32, #tpu.memory_space<vmem>>, %arg5: memref<14x1xf32, #tpu.memory_space<vmem>>, %arg6: memref<14x16xf32, #tpu.memory_space<vmem>>) attributes {dimension_semantics = [], scalar_prefetch = 0 : i64, scratch_operands = 0 : i64, tpu.core_type = #tpu.core_type<tc>} {
    %c0 = arith.constant 0 : index
    %c0_0 = arith.constant 0 : index
    %0 = vector.load %arg0[%c0, %c0_0] : memref<14x16xf32, #tpu.memory_space<vmem>>, vector<14x16xf32>
    %c0_1 = arith.constant 0 : index
    %c0_2 = arith.constant 0 : index
    %c0_3 = arith.constant 0 : index
    %1 = vector.load %arg1[%c0_1, %c0_2, %c0_3] : memref<6x14x14xf32, #tpu.memory_space<vmem>>, vector<1x14x14xf32>
    %2 = vector.shape_cast %1 : vector<1x14x14xf32> to vector<14x14xf32>
    %cst = arith.constant dense<0.000000e+00> : vector<14x16xf32>
    %3 = tpu.matmul %2, %0, %cst {dimension_numbers = #tpu.dot_dimension_numbers<[1], [0], [0], [1], [0, 0, 1, 1], [], []>} : vector<14x14xf32>, vector<14x16xf32>, vector<14x16xf32> -> vector<14x16xf32>
    %cst_4 = arith.constant dense<0.000000e+00> : vector<14xf32>
    %4 = vector.multi_reduction <add>, %3, %cst_4 [1] : vector<14x16xf32> to vector<14xf32>
    %5 = vector.shape_cast %4 : vector<14xf32> to vector<14x1xf32>
    %6 = arith.mulf %3, %3 : vector<14x16xf32>
    %cst_5 = arith.constant dense<0.000000e+00> : vector<14xf32>
    %7 = vector.multi_reduction <add>, %6, %cst_5 [1] : vector<14x16xf32> to vector<14xf32>
    %8 = vector.shape_cast %7 : vector<14xf32> to vector<14x1xf32>
    %cst_6 = arith.constant 6.250000e-02 : f32
    %9 = vector.broadcast %cst_6 : f32 to vector<14x1xf32>
    %10 = arith.mulf %5, %9 : vector<14x1xf32>
    %cst_7 = arith.constant 6.250000e-02 : f32
    %11 = vector.broadcast %cst_7 : f32 to vector<14x1xf32>
    %12 = arith.mulf %8, %11 : vector<14x1xf32>
    %13 = arith.mulf %10, %10 : vector<14x1xf32>
    %14 = arith.subf %12, %13 : vector<14x1xf32>
    %c0_8 = arith.constant 0 : index
    %c0_9 = arith.constant 0 : index
    %c0_10 = arith.constant 0 : index
    %15 = vector.load %arg2[%c0_8, %c0_9, %c0_10] : memref<6x14x1xf32, #tpu.memory_space<vmem>>, vector<1x14x1xf32>
    %16 = vector.shape_cast %15 : vector<1x14x1xf32> to vector<14x1xf32>
    %cst_11 = arith.constant 9.99999974E-6 : f32
    %17 = vector.broadcast %cst_11 : f32 to vector<14x1xf32>
    %18 = arith.addf %14, %17 : vector<14x1xf32>
    %19 = math.rsqrt %18 : vector<14x1xf32>
    %20 = arith.mulf %16, %19 : vector<14x1xf32>
    %c0_12 = arith.constant 0 : index
    %c0_13 = arith.constant 0 : index
    %c0_14 = arith.constant 0 : index
    %21 = vector.load %arg3[%c0_12, %c0_13, %c0_14] : memref<6x14x1xf32, #tpu.memory_space<vmem>>, vector<1x14x1xf32>
    %22 = vector.shape_cast %21 : vector<1x14x1xf32> to vector<14x1xf32>
    %23 = arith.mulf %10, %20 : vector<14x1xf32>
    %24 = arith.subf %22, %23 : vector<14x1xf32>
    %25 = vector.broadcast %20 : vector<14x1xf32> to vector<14x16xf32>
    %26 = arith.mulf %3, %25 : vector<14x16xf32>
    %27 = vector.broadcast %24 : vector<14x1xf32> to vector<14x16xf32>
    %28 = arith.addf %26, %27 : vector<14x16xf32>
    %cst_15 = arith.constant 0.000000e+00 : f32
    %29 = vector.broadcast %cst_15 : f32 to vector<14x16xf32>
    %30 = arith.maximumf %28, %29 : vector<14x16xf32>
    %c1 = arith.constant 1 : index
    %c0_16 = arith.constant 0 : index
    %c0_17 = arith.constant 0 : index
    %31 = vector.load %arg1[%c1, %c0_16, %c0_17] : memref<6x14x14xf32, #tpu.memory_space<vmem>>, vector<1x14x14xf32>
    %32 = vector.shape_cast %31 : vector<1x14x14xf32> to vector<14x14xf32>
    %cst_18 = arith.constant dense<0.000000e+00> : vector<14x16xf32>
    %33 = tpu.matmul %32, %30, %cst_18 {dimension_numbers = #tpu.dot_dimension_numbers<[1], [0], [0], [1], [0, 0, 1, 1], [], []>} : vector<14x14xf32>, vector<14x16xf32>, vector<14x16xf32> -> vector<14x16xf32>
    %cst_19 = arith.constant dense<0.000000e+00> : vector<14xf32>
    %34 = vector.multi_reduction <add>, %33, %cst_19 [1] : vector<14x16xf32> to vector<14xf32>
    %35 = vector.shape_cast %34 : vector<14xf32> to vector<14x1xf32>
    %36 = arith.mulf %33, %33 : vector<14x16xf32>
    %cst_20 = arith.constant dense<0.000000e+00> : vector<14xf32>
    %37 = vector.multi_reduction <add>, %36, %cst_20 [1] : vector<14x16xf32> to vector<14xf32>
    %38 = vector.shape_cast %37 : vector<14xf32> to vector<14x1xf32>
    %cst_21 = arith.constant 6.250000e-02 : f32
    %39 = vector.broadcast %cst_21 : f32 to vector<14x1xf32>
    %40 = arith.mulf %35, %39 : vector<14x1xf32>
    %cst_22 = arith.constant 6.250000e-02 : f32
    %41 = vector.broadcast %cst_22 : f32 to vector<14x1xf32>
    %42 = arith.mulf %38, %41 : vector<14x1xf32>
    %43 = arith.mulf %40, %40 : vector<14x1xf32>
    %44 = arith.subf %42, %43 : vector<14x1xf32>
    %c1_23 = arith.constant 1 : index
    %c0_24 = arith.constant 0 : index
    %c0_25 = arith.constant 0 : index
    %45 = vector.load %arg2[%c1_23, %c0_24, %c0_25] : memref<6x14x1xf32, #tpu.memory_space<vmem>>, vector<1x14x1xf32>
    %46 = vector.shape_cast %45 : vector<1x14x1xf32> to vector<14x1xf32>
    %cst_26 = arith.constant 9.99999974E-6 : f32
    %47 = vector.broadcast %cst_26 : f32 to vector<14x1xf32>
    %48 = arith.addf %44, %47 : vector<14x1xf32>
    %49 = math.rsqrt %48 : vector<14x1xf32>
    %50 = arith.mulf %46, %49 : vector<14x1xf32>
    %c1_27 = arith.constant 1 : index
    %c0_28 = arith.constant 0 : index
    %c0_29 = arith.constant 0 : index
    %51 = vector.load %arg3[%c1_27, %c0_28, %c0_29] : memref<6x14x1xf32, #tpu.memory_space<vmem>>, vector<1x14x1xf32>
    %52 = vector.shape_cast %51 : vector<1x14x1xf32> to vector<14x1xf32>
    %53 = arith.mulf %40, %50 : vector<14x1xf32>
    %54 = arith.subf %52, %53 : vector<14x1xf32>
    %55 = vector.broadcast %50 : vector<14x1xf32> to vector<14x16xf32>
    %56 = arith.mulf %33, %55 : vector<14x16xf32>
    %57 = vector.broadcast %54 : vector<14x1xf32> to vector<14x16xf32>
    %58 = arith.addf %56, %57 : vector<14x16xf32>
    %cst_30 = arith.constant 0.000000e+00 : f32
    %59 = vector.broadcast %cst_30 : f32 to vector<14x16xf32>
    %60 = arith.maximumf %58, %59 : vector<14x16xf32>
    %c2 = arith.constant 2 : index
    %c0_31 = arith.constant 0 : index
    %c0_32 = arith.constant 0 : index
    %61 = vector.load %arg1[%c2, %c0_31, %c0_32] : memref<6x14x14xf32, #tpu.memory_space<vmem>>, vector<1x14x14xf32>
    %62 = vector.shape_cast %61 : vector<1x14x14xf32> to vector<14x14xf32>
    %cst_33 = arith.constant dense<0.000000e+00> : vector<14x16xf32>
    %63 = tpu.matmul %62, %60, %cst_33 {dimension_numbers = #tpu.dot_dimension_numbers<[1], [0], [0], [1], [0, 0, 1, 1], [], []>} : vector<14x14xf32>, vector<14x16xf32>, vector<14x16xf32> -> vector<14x16xf32>
    %cst_34 = arith.constant dense<0.000000e+00> : vector<14xf32>
    %64 = vector.multi_reduction <add>, %63, %cst_34 [1] : vector<14x16xf32> to vector<14xf32>
    %65 = vector.shape_cast %64 : vector<14xf32> to vector<14x1xf32>
    %66 = arith.mulf %63, %63 : vector<14x16xf32>
    %cst_35 = arith.constant dense<0.000000e+00> : vector<14xf32>
    %67 = vector.multi_reduction <add>, %66, %cst_35 [1] : vector<14x16xf32> to vector<14xf32>
    %68 = vector.shape_cast %67 : vector<14xf32> to vector<14x1xf32>
    %cst_36 = arith.constant 6.250000e-02 : f32
    %69 = vector.broadcast %cst_36 : f32 to vector<14x1xf32>
    %70 = arith.mulf %65, %69 : vector<14x1xf32>
    %cst_37 = arith.constant 6.250000e-02 : f32
    %71 = vector.broadcast %cst_37 : f32 to vector<14x1xf32>
    %72 = arith.mulf %68, %71 : vector<14x1xf32>
    %73 = arith.mulf %70, %70 : vector<14x1xf32>
    %74 = arith.subf %72, %73 : vector<14x1xf32>
    %c2_38 = arith.constant 2 : index
    %c0_39 = arith.constant 0 : index
    %c0_40 = arith.constant 0 : index
    %75 = vector.load %arg2[%c2_38, %c0_39, %c0_40] : memref<6x14x1xf32, #tpu.memory_space<vmem>>, vector<1x14x1xf32>
    %76 = vector.shape_cast %75 : vector<1x14x1xf32> to vector<14x1xf32>
    %cst_41 = arith.constant 9.99999974E-6 : f32
    %77 = vector.broadcast %cst_41 : f32 to vector<14x1xf32>
    %78 = arith.addf %74, %77 : vector<14x1xf32>
    %79 = math.rsqrt %78 : vector<14x1xf32>
    %80 = arith.mulf %76, %79 : vector<14x1xf32>
    %c2_42 = arith.constant 2 : index
    %c0_43 = arith.constant 0 : index
    %c0_44 = arith.constant 0 : index
    %81 = vector.load %arg3[%c2_42, %c0_43, %c0_44] : memref<6x14x1xf32, #tpu.memory_space<vmem>>, vector<1x14x1xf32>
    %82 = vector.shape_cast %81 : vector<1x14x1xf32> to vector<14x1xf32>
    %83 = arith.mulf %70, %80 : vector<14x1xf32>
    %84 = arith.subf %82, %83 : vector<14x1xf32>
    %85 = vector.broadcast %80 : vector<14x1xf32> to vector<14x16xf32>
    %86 = arith.mulf %63, %85 : vector<14x16xf32>
    %87 = vector.broadcast %84 : vector<14x1xf32> to vector<14x16xf32>
    %88 = arith.addf %86, %87 : vector<14x16xf32>
    %cst_45 = arith.constant 0.000000e+00 : f32
    %89 = vector.broadcast %cst_45 : f32 to vector<14x16xf32>
    %90 = arith.maximumf %88, %89 : vector<14x16xf32>
    %c3 = arith.constant 3 : index
    %c0_46 = arith.constant 0 : index
    %c0_47 = arith.constant 0 : index
    %91 = vector.load %arg1[%c3, %c0_46, %c0_47] : memref<6x14x14xf32, #tpu.memory_space<vmem>>, vector<1x14x14xf32>
    %92 = vector.shape_cast %91 : vector<1x14x14xf32> to vector<14x14xf32>
    %cst_48 = arith.constant dense<0.000000e+00> : vector<14x16xf32>
    %93 = tpu.matmul %92, %90, %cst_48 {dimension_numbers = #tpu.dot_dimension_numbers<[1], [0], [0], [1], [0, 0, 1, 1], [], []>} : vector<14x14xf32>, vector<14x16xf32>, vector<14x16xf32> -> vector<14x16xf32>
    %cst_49 = arith.constant dense<0.000000e+00> : vector<14xf32>
    %94 = vector.multi_reduction <add>, %93, %cst_49 [1] : vector<14x16xf32> to vector<14xf32>
    %95 = vector.shape_cast %94 : vector<14xf32> to vector<14x1xf32>
    %96 = arith.mulf %93, %93 : vector<14x16xf32>
    %cst_50 = arith.constant dense<0.000000e+00> : vector<14xf32>
    %97 = vector.multi_reduction <add>, %96, %cst_50 [1] : vector<14x16xf32> to vector<14xf32>
    %98 = vector.shape_cast %97 : vector<14xf32> to vector<14x1xf32>
    %cst_51 = arith.constant 6.250000e-02 : f32
    %99 = vector.broadcast %cst_51 : f32 to vector<14x1xf32>
    %100 = arith.mulf %95, %99 : vector<14x1xf32>
    %cst_52 = arith.constant 6.250000e-02 : f32
    %101 = vector.broadcast %cst_52 : f32 to vector<14x1xf32>
    %102 = arith.mulf %98, %101 : vector<14x1xf32>
    %103 = arith.mulf %100, %100 : vector<14x1xf32>
    %104 = arith.subf %102, %103 : vector<14x1xf32>
    %c3_53 = arith.constant 3 : index
    %c0_54 = arith.constant 0 : index
    %c0_55 = arith.constant 0 : index
    %105 = vector.load %arg2[%c3_53, %c0_54, %c0_55] : memref<6x14x1xf32, #tpu.memory_space<vmem>>, vector<1x14x1xf32>
    %106 = vector.shape_cast %105 : vector<1x14x1xf32> to vector<14x1xf32>
    %cst_56 = arith.constant 9.99999974E-6 : f32
    %107 = vector.broadcast %cst_56 : f32 to vector<14x1xf32>
    %108 = arith.addf %104, %107 : vector<14x1xf32>
    %109 = math.rsqrt %108 : vector<14x1xf32>
    %110 = arith.mulf %106, %109 : vector<14x1xf32>
    %c3_57 = arith.constant 3 : index
    %c0_58 = arith.constant 0 : index
    %c0_59 = arith.constant 0 : index
    %111 = vector.load %arg3[%c3_57, %c0_58, %c0_59] : memref<6x14x1xf32, #tpu.memory_space<vmem>>, vector<1x14x1xf32>
    %112 = vector.shape_cast %111 : vector<1x14x1xf32> to vector<14x1xf32>
    %113 = arith.mulf %100, %110 : vector<14x1xf32>
    %114 = arith.subf %112, %113 : vector<14x1xf32>
    %115 = vector.broadcast %110 : vector<14x1xf32> to vector<14x16xf32>
    %116 = arith.mulf %93, %115 : vector<14x16xf32>
    %117 = vector.broadcast %114 : vector<14x1xf32> to vector<14x16xf32>
    %118 = arith.addf %116, %117 : vector<14x16xf32>
    %cst_60 = arith.constant 0.000000e+00 : f32
    %119 = vector.broadcast %cst_60 : f32 to vector<14x16xf32>
    %120 = arith.maximumf %118, %119 : vector<14x16xf32>
    %c4 = arith.constant 4 : index
    %c0_61 = arith.constant 0 : index
    %c0_62 = arith.constant 0 : index
    %121 = vector.load %arg1[%c4, %c0_61, %c0_62] : memref<6x14x14xf32, #tpu.memory_space<vmem>>, vector<1x14x14xf32>
    %122 = vector.shape_cast %121 : vector<1x14x14xf32> to vector<14x14xf32>
    %cst_63 = arith.constant dense<0.000000e+00> : vector<14x16xf32>
    %123 = tpu.matmul %122, %120, %cst_63 {dimension_numbers = #tpu.dot_dimension_numbers<[1], [0], [0], [1], [0, 0, 1, 1], [], []>} : vector<14x14xf32>, vector<14x16xf32>, vector<14x16xf32> -> vector<14x16xf32>
    %cst_64 = arith.constant dense<0.000000e+00> : vector<14xf32>
    %124 = vector.multi_reduction <add>, %123, %cst_64 [1] : vector<14x16xf32> to vector<14xf32>
    %125 = vector.shape_cast %124 : vector<14xf32> to vector<14x1xf32>
    %126 = arith.mulf %123, %123 : vector<14x16xf32>
    %cst_65 = arith.constant dense<0.000000e+00> : vector<14xf32>
    %127 = vector.multi_reduction <add>, %126, %cst_65 [1] : vector<14x16xf32> to vector<14xf32>
    %128 = vector.shape_cast %127 : vector<14xf32> to vector<14x1xf32>
    %cst_66 = arith.constant 6.250000e-02 : f32
    %129 = vector.broadcast %cst_66 : f32 to vector<14x1xf32>
    %130 = arith.mulf %125, %129 : vector<14x1xf32>
    %cst_67 = arith.constant 6.250000e-02 : f32
    %131 = vector.broadcast %cst_67 : f32 to vector<14x1xf32>
    %132 = arith.mulf %128, %131 : vector<14x1xf32>
    %133 = arith.mulf %130, %130 : vector<14x1xf32>
    %134 = arith.subf %132, %133 : vector<14x1xf32>
    %c4_68 = arith.constant 4 : index
    %c0_69 = arith.constant 0 : index
    %c0_70 = arith.constant 0 : index
    %135 = vector.load %arg2[%c4_68, %c0_69, %c0_70] : memref<6x14x1xf32, #tpu.memory_space<vmem>>, vector<1x14x1xf32>
    %136 = vector.shape_cast %135 : vector<1x14x1xf32> to vector<14x1xf32>
    %cst_71 = arith.constant 9.99999974E-6 : f32
    %137 = vector.broadcast %cst_71 : f32 to vector<14x1xf32>
    %138 = arith.addf %134, %137 : vector<14x1xf32>
    %139 = math.rsqrt %138 : vector<14x1xf32>
    %140 = arith.mulf %136, %139 : vector<14x1xf32>
    %c4_72 = arith.constant 4 : index
    %c0_73 = arith.constant 0 : index
    %c0_74 = arith.constant 0 : index
    %141 = vector.load %arg3[%c4_72, %c0_73, %c0_74] : memref<6x14x1xf32, #tpu.memory_space<vmem>>, vector<1x14x1xf32>
    %142 = vector.shape_cast %141 : vector<1x14x1xf32> to vector<14x1xf32>
    %143 = arith.mulf %130, %140 : vector<14x1xf32>
    %144 = arith.subf %142, %143 : vector<14x1xf32>
    %145 = vector.broadcast %140 : vector<14x1xf32> to vector<14x16xf32>
    %146 = arith.mulf %123, %145 : vector<14x16xf32>
    %147 = vector.broadcast %144 : vector<14x1xf32> to vector<14x16xf32>
    %148 = arith.addf %146, %147 : vector<14x16xf32>
    %cst_75 = arith.constant 0.000000e+00 : f32
    %149 = vector.broadcast %cst_75 : f32 to vector<14x16xf32>
    %150 = arith.maximumf %148, %149 : vector<14x16xf32>
    %c5 = arith.constant 5 : index
    %c0_76 = arith.constant 0 : index
    %c0_77 = arith.constant 0 : index
    %151 = vector.load %arg1[%c5, %c0_76, %c0_77] : memref<6x14x14xf32, #tpu.memory_space<vmem>>, vector<1x14x14xf32>
    %152 = vector.shape_cast %151 : vector<1x14x14xf32> to vector<14x14xf32>
    %cst_78 = arith.constant dense<0.000000e+00> : vector<14x16xf32>
    %153 = tpu.matmul %152, %150, %cst_78 {dimension_numbers = #tpu.dot_dimension_numbers<[1], [0], [0], [1], [0, 0, 1, 1], [], []>} : vector<14x14xf32>, vector<14x16xf32>, vector<14x16xf32> -> vector<14x16xf32>
    %cst_79 = arith.constant dense<0.000000e+00> : vector<14xf32>
    %154 = vector.multi_reduction <add>, %153, %cst_79 [1] : vector<14x16xf32> to vector<14xf32>
    %155 = vector.shape_cast %154 : vector<14xf32> to vector<14x1xf32>
    %156 = arith.mulf %153, %153 : vector<14x16xf32>
    %cst_80 = arith.constant dense<0.000000e+00> : vector<14xf32>
    %157 = vector.multi_reduction <add>, %156, %cst_80 [1] : vector<14x16xf32> to vector<14xf32>
    %158 = vector.shape_cast %157 : vector<14xf32> to vector<14x1xf32>
    %cst_81 = arith.constant 6.250000e-02 : f32
    %159 = vector.broadcast %cst_81 : f32 to vector<14x1xf32>
    %160 = arith.mulf %155, %159 : vector<14x1xf32>
    %cst_82 = arith.constant 6.250000e-02 : f32
    %161 = vector.broadcast %cst_82 : f32 to vector<14x1xf32>
    %162 = arith.mulf %158, %161 : vector<14x1xf32>
    %163 = arith.mulf %160, %160 : vector<14x1xf32>
    %164 = arith.subf %162, %163 : vector<14x1xf32>
    %c5_83 = arith.constant 5 : index
    %c0_84 = arith.constant 0 : index
    %c0_85 = arith.constant 0 : index
    %165 = vector.load %arg2[%c5_83, %c0_84, %c0_85] : memref<6x14x1xf32, #tpu.memory_space<vmem>>, vector<1x14x1xf32>
    %166 = vector.shape_cast %165 : vector<1x14x1xf32> to vector<14x1xf32>
    %cst_86 = arith.constant 9.99999974E-6 : f32
    %167 = vector.broadcast %cst_86 : f32 to vector<14x1xf32>
    %168 = arith.addf %164, %167 : vector<14x1xf32>
    %169 = math.rsqrt %168 : vector<14x1xf32>
    %170 = arith.mulf %166, %169 : vector<14x1xf32>
    %c5_87 = arith.constant 5 : index
    %c0_88 = arith.constant 0 : index
    %c0_89 = arith.constant 0 : index
    %171 = vector.load %arg3[%c5_87, %c0_88, %c0_89] : memref<6x14x1xf32, #tpu.memory_space<vmem>>, vector<1x14x1xf32>
    %172 = vector.shape_cast %171 : vector<1x14x1xf32> to vector<14x1xf32>
    %173 = arith.mulf %160, %170 : vector<14x1xf32>
    %174 = arith.subf %172, %173 : vector<14x1xf32>
    %175 = vector.broadcast %170 : vector<14x1xf32> to vector<14x16xf32>
    %176 = arith.mulf %153, %175 : vector<14x16xf32>
    %177 = vector.broadcast %174 : vector<14x1xf32> to vector<14x16xf32>
    %178 = arith.addf %176, %177 : vector<14x16xf32>
    %cst_90 = arith.constant 0.000000e+00 : f32
    %179 = vector.broadcast %cst_90 : f32 to vector<14x16xf32>
    %180 = arith.maximumf %178, %179 : vector<14x16xf32>
    %c0_91 = arith.constant 0 : index
    %c0_92 = arith.constant 0 : index
    %181 = vector.load %arg4[%c0_91, %c0_92] : memref<14x14xf32, #tpu.memory_space<vmem>>, vector<14x14xf32>
    %cst_93 = arith.constant dense<0.000000e+00> : vector<14x16xf32>
    %182 = tpu.matmul %181, %180, %cst_93 {dimension_numbers = #tpu.dot_dimension_numbers<[1], [0], [0], [1], [0, 0, 1, 1], [], []>} : vector<14x14xf32>, vector<14x16xf32>, vector<14x16xf32> -> vector<14x16xf32>
    %c0_94 = arith.constant 0 : index
    %c0_95 = arith.constant 0 : index
    %183 = vector.load %arg5[%c0_94, %c0_95] : memref<14x1xf32, #tpu.memory_space<vmem>>, vector<14x1xf32>
    %184 = vector.broadcast %183 : vector<14x1xf32> to vector<14x16xf32>
    %185 = arith.addf %182, %184 : vector<14x16xf32>
    %c0_96 = arith.constant 0 : index
    %c0_97 = arith.constant 0 : index
    %186 = vector.load %arg6[%c0_96, %c0_97] : memref<14x16xf32, #tpu.memory_space<vmem>>, vector<14x16xf32>
    tpu.vector_store %arg6[%c0_96, %c0_97], %185 {strides = array<i32>} : memref<14x16xf32, #tpu.memory_space<vmem>>, vector<14x16xf32>,
    return
  }
}

</mosaic_0001>

<bundles_post_ra>
// kernel: fcnet_forward.1
= control target key start
LH: loop header
LB: loop body
LE: loop exit
PB: predicated region body
PF: predicated region fallthrough
CT: control target
= control target key end

     0   :  { %vm34_vm0 = vcmask 1045504   ;;  %vm27_vm1 = vcmask 113664   ;;  %vm1234_vm2 = vmmov 1   ;;  %vm113_vm4 = vcmask 130048   ;;  %s1475_s0 = inlined_call_operand.vmem [shape: f32[14,16], index: 0, kind: input, shape index: {}]   ;;  %s1476_s1 = inlined_call_operand.vmem [shape: f32[6,14,14], index: 1, kind: input, shape index: {}]   ;;  %s1477_s2 = inlined_call_operand.vmem [shape: f32[6,14,1], index: 2, kind: input, shape index: {}]   ;;  %s1478_s3 = inlined_call_operand.vmem [shape: f32[6,14,1], index: 3, kind: input, shape index: {}]   ;;  %s1479_s5 = inlined_call_operand.vmem [shape: f32[14,1], index: 5, kind: input, shape index: {}]   ;;  %s1480_s4 = inlined_call_operand.vmem [shape: f32[14,14], index: 4, kind: input, shape index: {}]   ;;  %s1481_s6 = inlined_call_operand.vmem [shape: f32[14,16], index: 6, kind: output, shape index: {}]  }
   0x1   :  { %v23_v0 = vld [vmem:[%s1475_s0] sm:$0xff]  ;;  %v24_v1 = vld [vmem:[%s1475_s0 + $0x8] sm:$0x3f]  ;;  %vm1277_vm3 = vmpackc.low %vm34_vm0, %vm1234_vm2  ;;  %vm117_vm5 = vcmask 128000   ;;  %v1235_v14 = vmov 0  }
   0x2   :  { %v1164_v3 = vpack.c.bf16 %v24_v1, %v23_v0  ;;  %v25_v4 = vld [vmem:[%s1476_s1] sm:$0xff]  ;;  %v26_v5 = vld [vmem:[%s1476_s1 + $0x8] sm:$0x3f]  ;;  %1208 = vset.pattern.permute.xlu0 %v1235_v14  ;;  %1209 = vset.pattern.permute.xlu1 %v1235_v14  ;;  %v1039_v41 = vld [vmem:[%s1476_s1 + $0x10] sm:$0xff] }
   0x3   :  { %1119 = vmatprep.mubr.msk.f32.mxu0 %vm27_vm1, %v25_v4  ;;  %v137_v29 = vld [vmem:[%s1477_s2] sm:$0xff]  ;;  %v138_v32 = vld [vmem:[%s1477_s2 + $0x8] sm:$0x3f]  ;;  %1126 = vmatprep.mubr.msk.f32.mxu1 %vm27_vm1, %v1039_v41  ;;  %v1040_v53 = vld [vmem:[%s1476_s1 + $0x18] sm:$0x3f] }
   0x4   :  { %1166 = vmatprep.subr.msk.bf16.mxu0 %vm1277_vm3, %v1164_v3  ;;  %v145_v36 = vld [vmem:[%s1478_s3] sm:$0xff]  ;;  %v146_v39 = vld [vmem:[%s1478_s3 + $0x8] sm:$0x3f] }
   0x5   :  { %1169 = vmatpush3.bf16.msk.msra.mxu0 %vm1277_vm3, %v1164_v3 }
   0x8   :  { %1120 = vmatmul.mubr.msk.f32.vlgmr.msra.gmra.mrb[0].mxu0 %vm27_vm1, %v26_v5 }
  0xdb   :  { %v1121_v6 = vpop.f32.mrb[0].mxu0 }
  0xdc   :  { %v104_v7 = vpop.f32.mrb[1].mxu0  ;;  %v122_v11 = vmul.f32 %v1121_v6, %v1121_v6  ;;  %v118_v12 = vsel %vm117_vm5, %v1121_v6, 0.0 }
  0xdd   :  { %v114_v8 = vsel %vm113_vm4, %v104_v7, 0.0  ;;  %v121_v9 = vmul.f32 %v104_v7, %v104_v7 }
  0xde   :  { %115 = vadd.xlane.f32.xlu0 %v114_v8  ;;  %v126_v13 = vsel %vm117_vm5, %v122_v11, 0.0 }
  0xdf   :  { %v123_v10 = vsel %vm113_vm4, %v121_v9, 0.0 }
  0xe0   :  { %124 = vadd.xlane.f32.xlu1 %v123_v10 }
  0xe2   :  { %119 = vadd.xlane.f32.xlu0 %v118_v12 }
  0xe4   :  { %127 = vadd.xlane.f32.xlu1 %v126_v13  ;;  %v1044_v13 = vld [vmem:[%s1477_s2 + $0x10] sm:$0xff] }
 0x16b   :  { %v116_v15 = vpop.xlane.xlu0 %115 }
 0x16c   :  { %v129_v16 = vmul.f32 0.0625, %v116_v15 }
 0x16d   :  { %v125_v17 = vpop.xlane.xlu1 %124 }
 0x16e   :  { %v133_v18 = vmul.f32 %v129_v16, %v129_v16  ;;  %v131_v19 = vmul.f32 0.0625, %v125_v17  ;;  %v1045_v17 = vld [vmem:[%s1477_s2 + $0x18] sm:$0x3f] }
 0x16f   :  { %v120_v20 = vpop.xlane.xlu0 %119 }
 0x170   :  { %v135_v21 = vsub.f32 %v131_v19, %v133_v18  ;;  %v130_v22 = vmul.f32 0.0625, %v120_v20 }
 0x171   :  { %v128_v23 = vpop.xlane.xlu1 %127 }
 0x172   :  { %v139_v24 = vadd.f32 1e-05, %v135_v21  ;;  %v134_v25 = vmul.f32 %v130_v22, %v130_v22  ;;  %v132_v26 = vmul.f32 0.0625, %v128_v23 }
 0x174   :  { %1210 = vrsqrt.f32 %v139_v24  ;;  %v136_v27 = vsub.f32 %v132_v26, %v134_v25  ;;  %v1048_v25 = vld [vmem:[%s1476_s1 + $0x20] sm:$0xff] }
 0x175   :  { %1133 = vmatprep.mubr.msk.f32.mxu0 %vm27_vm1, %v1048_v25 }
 0x176   :  { %v140_v28 = vadd.f32 1e-05, %v136_v27 }
 0x178   :  { %1212 = vrsqrt.f32 %v140_v28 }
 0x17e   :  { %v1211_v30 = vpop.eup %1210 }
 0x17f   :  { %v143_v31 = vmul.f32 %v1211_v30, %v137_v29 }
 0x181   :  { %153 = vperm.xlu0 %1208, %v143_v31   ;;  %v147_v35 = vmul.f32 %v143_v31, %v129_v16  ;;  %v1046_v16 = vld [vmem:[%s1478_s3 + $0x10] sm:$0xff] }
 0x182   :  { %v1213_v33 = vpop.eup %1212 }
 0x183   :  { %v144_v34 = vmul.f32 %v1213_v33, %v138_v32  ;;  %v149_v37 = vsub.f32 %v145_v36, %v147_v35 }
 0x185   :  { %158 = vperm.xlu1 %1209, %v144_v34   ;;  %v148_v38 = vmul.f32 %v144_v34, %v130_v22  ;;  %v1047_v22 = vld [vmem:[%s1478_s3 + $0x18] sm:$0x3f] }
 0x187   :  { %v150_v40 = vsub.f32 %v146_v39, %v148_v38 }
 0x189   :  { %165 = vperm.xlu1 %1209, %v149_v37   ;;  %v1049_v37 = vld [vmem:[%s1476_s1 + $0x28] sm:$0x3f] }
 0x18d   :  { %170 = vperm.xlu1 %1209, %v150_v40  }
 0x200   :  { %v154_v43 = vpop.permute.xlu0 %153 }
 0x201   :  { %v161_v45 = vmul.f32 %v154_v43, %v104_v7 }
 0x204   :  { %v159_v42 = vpop.permute.xlu1 %158 }
 0x205   :  { %v162_v46 = vmul.f32 %v1121_v6, %v159_v42 }
 0x208   :  { %v166_v44 = vpop.permute.xlu1 %165 }
 0x209   :  { %v173_v47 = vadd.f32 %v166_v44, %v161_v45 }
 0x20b   :  { %v175_v50 = vmax.f32 %v173_v47, 0.0 }
 0x20c   :  { %v171_v48 = vpop.permute.xlu1 %170 }
 0x20d   :  { %v174_v49 = vadd.f32 %v171_v48, %v162_v46 }
 0x20f   :  { %v176_v51 = vmax.f32 %v174_v49, 0.0 }
 0x211   :  { %v1170_v52 = vpack.c.bf16 %v176_v51, %v175_v50 }
 0x213   :  { %1172 = vmatprep.subr.msk.bf16.mxu1 %vm1277_vm3, %v1170_v52 }
 0x214   :  { %1175 = vmatpush3.bf16.msk.msra.mxu1 %vm1277_vm3, %v1170_v52 }
 0x217   :  { %1127 = vmatmul.mubr.msk.f32.vlgmr.msra.gmra.mrb[0].mxu1 %vm27_vm1, %v1040_v53 }
 0x2ea   :  { %v1128_v54 = vpop.f32.mrb[0].mxu1 }
 0x2eb   :  { %v255_v55 = vpop.f32.mrb[1].mxu1  ;;  %v267_v56 = vsel %vm117_vm5, %v1128_v54, 0.0  ;;  %v271_v60 = vmul.f32 %v1128_v54, %v1128_v54 }
 0x2ec   :  { %268 = vadd.xlane.f32.xlu0 %v267_v56  ;;  %v264_v57 = vsel %vm113_vm4, %v255_v55, 0.0  ;;  %v270_v58 = vmul.f32 %v255_v55, %v255_v55 }
 0x2ed   :  { %265 = vadd.xlane.f32.xlu1 %v264_v57  ;;  %v275_v61 = vsel %vm117_vm5, %v271_v60, 0.0  ;;  %v1053_v60 = vld [vmem:[%s1477_s2 + $0x20] sm:$0xff] }
 0x2ee   :  { %v272_v59 = vsel %vm113_vm4, %v270_v58, 0.0 }
 0x2f1   :  { %273 = vadd.xlane.f32.xlu1 %v272_v59 }
 0x2f5   :  { %276 = vadd.xlane.f32.xlu1 %v275_v61  ;;  %v1054_v61 = vld [vmem:[%s1477_s2 + $0x28] sm:$0x3f] }
 0x379   :  { %v269_v0 = vpop.xlane.xlu0 %268 }
 0x37a   :  { %v266_v62 = vpop.xlane.xlu1 %265  ;;  %v279_v3 = vmul.f32 0.0625, %v269_v0 }
 0x37b   :  { %v278_v63 = vmul.f32 0.0625, %v266_v62 }
 0x37c   :  { %v283_v8 = vmul.f32 %v279_v3, %v279_v3 }
 0x37d   :  { %v282_v4 = vmul.f32 %v278_v63, %v278_v63 }
 0x37e   :  { %v274_v1 = vpop.xlane.xlu1 %273 }
 0x37f   :  { %v280_v5 = vmul.f32 0.0625, %v274_v1 }
 0x381   :  { %v284_v6 = vsub.f32 %v280_v5, %v282_v4  ;;  %v1056_v5 = vld [vmem:[%s1478_s3 + $0x28] sm:$0x3f] }
 0x382   :  { %v277_v7 = vpop.xlane.xlu1 %276 }
 0x383   :  { %v289_v9 = vadd.f32 1e-05, %v284_v6  ;;  %v281_v10 = vmul.f32 0.0625, %v277_v7 }
 0x385   :  { %1214 = vrsqrt.f32 %v289_v9  ;;  %v285_v11 = vsub.f32 %v281_v10, %v283_v8  ;;  %v1057_v9 = vld [vmem:[%s1476_s1 + $0x30] sm:$0xff] }
 0x386   :  { %1140 = vmatprep.mubr.msk.f32.mxu1 %vm27_vm1, %v1057_v9 }
 0x387   :  { %v290_v12 = vadd.f32 1e-05, %v285_v11 }
 0x389   :  { %1216 = vrsqrt.f32 %v290_v12 }
 0x38f   :  { %v1215_v14 = vpop.eup %1214 }
 0x390   :  { %v293_v15 = vmul.f32 %v1215_v14, %v1044_v13 }
 0x392   :  { %304 = vperm.xlu1 %1209, %v293_v15   ;;  %v298_v18 = vmul.f32 %v293_v15, %v278_v63 }
 0x393   :  { %v1217_v19 = vpop.eup %1216 }
 0x394   :  { %v300_v20 = vsub.f32 %v1046_v16, %v298_v18  ;;  %v294_v21 = vmul.f32 %v1217_v19, %v1045_v17 }
 0x396   :  { %316 = vperm.xlu1 %1209, %v300_v20   ;;  %309 = vperm.xlu0 %1208, %v294_v21   ;;  %v299_v23 = vmul.f32 %v294_v21, %v279_v3  ;;  %v1055_v3 = vld [vmem:[%s1478_s3 + $0x20] sm:$0xff]  ;;  %v1058_v21 = vld [vmem:[%s1476_s1 + $0x38] sm:$0x3f] }
 0x398   :  { %v301_v24 = vsub.f32 %v1047_v22, %v299_v23 }
 0x39a   :  { %321 = vperm.xlu1 %1209, %v301_v24  }
 0x411   :  { %v305_v26 = vpop.permute.xlu1 %304 }
 0x412   :  { %v312_v29 = vmul.f32 %v305_v26, %v255_v55 }
 0x415   :  { %v310_v27 = vpop.permute.xlu0 %309  ;;  %v317_v28 = vpop.permute.xlu1 %316 }
 0x416   :  { %v313_v30 = vmul.f32 %v1128_v54, %v310_v27  ;;  %v324_v31 = vadd.f32 %v317_v28, %v312_v29 }
 0x418   :  { %v326_v34 = vmax.f32 %v324_v31, 0.0 }
 0x419   :  { %v322_v32 = vpop.permute.xlu1 %321 }
 0x41a   :  { %v325_v33 = vadd.f32 %v322_v32, %v313_v30 }
 0x41c   :  { %v327_v35 = vmax.f32 %v325_v33, 0.0 }
 0x41e   :  { %v1176_v36 = vpack.c.bf16 %v327_v35, %v326_v34 }
 0x420   :  { %1178 = vmatprep.subr.msk.bf16.mxu0 %vm1277_vm3, %v1176_v36 }
 0x421   :  { %1181 = vmatpush3.bf16.msk.msra.mxu0 %vm1277_vm3, %v1176_v36 }
 0x424   :  { %1134 = vmatmul.mubr.msk.f32.vlgmr.msra.gmra.mrb[2].mxu0 %vm27_vm1, %v1049_v37 }
 0x4f7   :  { %v1135_v38 = vpop.f32.mrb[2].mxu0 }
 0x4f8   :  { %v406_v39 = vpop.f32.mrb[3].mxu0  ;;  %v418_v40 = vsel %vm117_vm5, %v1135_v38, 0.0  ;;  %v422_v43 = vmul.f32 %v1135_v38, %v1135_v38 }
 0x4f9   :  { %419 = vadd.xlane.f32.xlu0 %v418_v40  ;;  %v415_v41 = vsel %vm113_vm4, %v406_v39, 0.0  ;;  %v421_v42 = vmul.f32 %v406_v39, %v406_v39 }
 0x4fa   :  { %416 = vadd.xlane.f32.xlu1 %v415_v41  ;;  %v426_v45 = vsel %vm117_vm5, %v422_v43, 0.0 }
 0x4fb   :  { %v423_v44 = vsel %vm113_vm4, %v421_v42, 0.0 }
 0x4fd   :  { %424 = vadd.xlane.f32.xlu0 %v423_v44  ;;  %v1062_v44 = vld [vmem:[%s1477_s2 + $0x30] sm:$0xff] }
 0x4fe   :  { %427 = vadd.xlane.f32.xlu1 %v426_v45  ;;  %v1063_v45 = vld [vmem:[%s1477_s2 + $0x38] sm:$0x3f] }
 0x586   :  { %v420_v46 = vpop.xlane.xlu0 %419 }
 0x587   :  { %v417_v47 = vpop.xlane.xlu1 %416  ;;  %v430_v48 = vmul.f32 0.0625, %v420_v46 }
 0x588   :  { %v429_v49 = vmul.f32 0.0625, %v417_v47 }
 0x589   :  { %v434_v54 = vmul.f32 %v430_v48, %v430_v48 }
 0x58a   :  { %v433_v50 = vmul.f32 %v429_v49, %v429_v49  ;;  %v425_v51 = vpop.xlane.xlu0 %424 }
 0x58b   :  { %v431_v52 = vmul.f32 0.0625, %v425_v51  ;;  %v428_v53 = vpop.xlane.xlu1 %427 }
 0x58c   :  { %v432_v55 = vmul.f32 0.0625, %v428_v53 }
 0x58d   :  { %v435_v56 = vsub.f32 %v431_v52, %v433_v50  ;;  %v1064_v50 = vld [vmem:[%s1478_s3 + $0x30] sm:$0xff]  ;;  %v1065_v52 = vld [vmem:[%s1478_s3 + $0x38] sm:$0x3f] }
 0x58e   :  { %v436_v57 = vsub.f32 %v432_v55, %v434_v54 }
 0x58f   :  { %v440_v58 = vadd.f32 1e-05, %v435_v56  ;;  %v1066_v56 = vld [vmem:[%s1476_s1 + $0x40] sm:$0xff] }
 0x590   :  { %v441_v59 = vadd.f32 1e-05, %v436_v57  ;;  %1147 = vmatprep.mubr.msk.f32.mxu0 %vm27_vm1, %v1066_v56 }
 0x591   :  { %1218 = vrsqrt.f32 %v440_v58 }
 0x592   :  { %1220 = vrsqrt.f32 %v441_v59 }
 0x59b   :  { %v1219_v62 = vpop.eup %1218 }
 0x59c   :  { %v1221_v63 = vpop.eup %1220  ;;  %v444_v0 = vmul.f32 %v1219_v62, %v1053_v60 }
 0x59d   :  { %v445_v1 = vmul.f32 %v1221_v63, %v1054_v61 }
 0x59e   :  { %455 = vperm.xlu0 %1208, %v444_v0   ;;  %v449_v4 = vmul.f32 %v444_v0, %v429_v49 }
 0x59f   :  { %460 = vperm.xlu1 %1209, %v445_v1   ;;  %v450_v6 = vmul.f32 %v445_v1, %v430_v48 }
 0x5a0   :  { %v451_v7 = vsub.f32 %v1055_v3, %v449_v4 }
 0x5a1   :  { %v452_v8 = vsub.f32 %v1056_v5, %v450_v6  ;;  %v1067_v5 = vld [vmem:[%s1476_s1 + $0x48] sm:$0x3f] }
 0x5a3   :  { %467 = vperm.xlu1 %1209, %v451_v7   ;;  %472 = vperm.xlu0 %1208, %v452_v8  }
 0x61d   :  { %v456_v10 = vpop.permute.xlu0 %455 }
 0x61e   :  { %v461_v11 = vpop.permute.xlu1 %460  ;;  %v463_v12 = vmul.f32 %v456_v10, %v406_v39 }
 0x61f   :  { %v464_v13 = vmul.f32 %v1135_v38, %v461_v11 }
 0x622   :  { %v468_v14 = vpop.permute.xlu1 %467  ;;  %v473_v15 = vpop.permute.xlu0 %472 }
 0x623   :  { %v475_v16 = vadd.f32 %v468_v14, %v463_v12  ;;  %v476_v17 = vadd.f32 %v473_v15, %v464_v13 }
 0x625   :  { %v477_v18 = vmax.f32 %v475_v16, 0.0  ;;  %v478_v19 = vmax.f32 %v476_v17, 0.0 }
 0x627   :  { %v1182_v20 = vpack.c.bf16 %v478_v19, %v477_v18 }
 0x629   :  { %1184 = vmatprep.subr.msk.bf16.mxu1 %vm1277_vm3, %v1182_v20 }
 0x62a   :  { %1187 = vmatpush3.bf16.msk.msra.mxu1 %vm1277_vm3, %v1182_v20 }
 0x62d   :  { %1141 = vmatmul.mubr.msk.f32.vlgmr.msra.gmra.mrb[2].mxu1 %vm27_vm1, %v1058_v21 }
 0x700   :  { %v1142_v22 = vpop.f32.mrb[2].mxu1 }
 0x701   :  { %v557_v23 = vpop.f32.mrb[3].mxu1  ;;  %v569_v24 = vsel %vm117_vm5, %v1142_v22, 0.0  ;;  %v573_v27 = vmul.f32 %v1142_v22, %v1142_v22 }
 0x702   :  { %570 = vadd.xlane.f32.xlu0 %v569_v24  ;;  %v566_v25 = vsel %vm113_vm4, %v557_v23, 0.0  ;;  %v572_v26 = vmul.f32 %v557_v23, %v557_v23 }
 0x703   :  { %567 = vadd.xlane.f32.xlu1 %v566_v25  ;;  %v577_v29 = vsel %vm117_vm5, %v573_v27, 0.0 }
 0x704   :  { %v574_v28 = vsel %vm113_vm4, %v572_v26, 0.0 }
 0x706   :  { %575 = vadd.xlane.f32.xlu0 %v574_v28  ;;  %v1071_v28 = vld [vmem:[%s1477_s2 + $0x40] sm:$0xff] }
 0x707   :  { %578 = vadd.xlane.f32.xlu1 %v577_v29  ;;  %v1072_v29 = vld [vmem:[%s1477_s2 + $0x48] sm:$0x3f] }
 0x78f   :  { %v571_v30 = vpop.xlane.xlu0 %570 }
 0x790   :  { %v568_v31 = vpop.xlane.xlu1 %567  ;;  %v581_v32 = vmul.f32 0.0625, %v571_v30 }
 0x791   :  { %v580_v33 = vmul.f32 0.0625, %v568_v31 }
 0x792   :  { %v585_v38 = vmul.f32 %v581_v32, %v581_v32 }
 0x793   :  { %v584_v34 = vmul.f32 %v580_v33, %v580_v33  ;;  %v576_v35 = vpop.xlane.xlu0 %575 }
 0x794   :  { %v582_v36 = vmul.f32 0.0625, %v576_v35  ;;  %v579_v37 = vpop.xlane.xlu1 %578 }
 0x795   :  { %v583_v39 = vmul.f32 0.0625, %v579_v37 }
 0x796   :  { %v586_v40 = vsub.f32 %v582_v36, %v584_v34  ;;  %v1073_v34 = vld [vmem:[%s1478_s3 + $0x40] sm:$0xff]  ;;  %v1074_v36 = vld [vmem:[%s1478_s3 + $0x48] sm:$0x3f] }
 0x797   :  { %v587_v41 = vsub.f32 %v583_v39, %v585_v38 }
 0x798   :  { %v591_v42 = vadd.f32 1e-05, %v586_v40  ;;  %v1075_v40 = vld [vmem:[%s1476_s1 + $0x50] sm:$0xff] }
 0x799   :  { %v592_v43 = vadd.f32 1e-05, %v587_v41  ;;  %1154 = vmatprep.mubr.msk.f32.mxu1 %vm27_vm1, %v1075_v40 }
 0x79a   :  { %1222 = vrsqrt.f32 %v591_v42 }
 0x79b   :  { %1224 = vrsqrt.f32 %v592_v43 }
 0x7a4   :  { %v1223_v46 = vpop.eup %1222 }
 0x7a5   :  { %v1225_v47 = vpop.eup %1224  ;;  %v595_v48 = vmul.f32 %v1223_v46, %v1062_v44 }
 0x7a6   :  { %v596_v49 = vmul.f32 %v1225_v47, %v1063_v45 }
 0x7a7   :  { %606 = vperm.xlu0 %1208, %v595_v48   ;;  %v600_v51 = vmul.f32 %v595_v48, %v580_v33 }
 0x7a8   :  { %611 = vperm.xlu1 %1209, %v596_v49   ;;  %v601_v53 = vmul.f32 %v596_v49, %v581_v32 }
 0x7a9   :  { %v602_v54 = vsub.f32 %v1064_v50, %v600_v51 }
 0x7aa   :  { %v603_v55 = vsub.f32 %v1065_v52, %v601_v53  ;;  %v1076_v52 = vld [vmem:[%s1476_s1 + $0x58] sm:$0x3f] }
 0x7ac   :  { %618 = vperm.xlu1 %1209, %v602_v54   ;;  %623 = vperm.xlu0 %1208, %v603_v55  }
 0x826   :  { %v607_v57 = vpop.permute.xlu0 %606 }
 0x827   :  { %v612_v58 = vpop.permute.xlu1 %611  ;;  %v614_v59 = vmul.f32 %v607_v57, %v557_v23 }
 0x828   :  { %v615_v60 = vmul.f32 %v1142_v22, %v612_v58 }
 0x82b   :  { %v619_v61 = vpop.permute.xlu1 %618  ;;  %v624_v62 = vpop.permute.xlu0 %623 }
 0x82c   :  { %v626_v63 = vadd.f32 %v619_v61, %v614_v59  ;;  %v627_v0 = vadd.f32 %v624_v62, %v615_v60 }
 0x82e   :  { %v628_v1 = vmax.f32 %v626_v63, 0.0  ;;  %v629_v3 = vmax.f32 %v627_v0, 0.0 }
 0x830   :  { %v1188_v4 = vpack.c.bf16 %v629_v3, %v628_v1 }
 0x832   :  { %1190 = vmatprep.subr.msk.bf16.mxu0 %vm1277_vm3, %v1188_v4 }
 0x833   :  { %1193 = vmatpush3.bf16.msk.msra.mxu0 %vm1277_vm3, %v1188_v4 }
 0x836   :  { %1148 = vmatmul.mubr.msk.f32.vlgmr.msra.gmra.mrb[4].mxu0 %vm27_vm1, %v1067_v5 }
 0x909   :  { %v1149_v6 = vpop.f32.mrb[4].mxu0 }
 0x90a   :  { %v708_v7 = vpop.f32.mrb[5].mxu0  ;;  %v720_v8 = vsel %vm117_vm5, %v1149_v6, 0.0  ;;  %v724_v11 = vmul.f32 %v1149_v6, %v1149_v6 }
 0x90b   :  { %721 = vadd.xlane.f32.xlu0 %v720_v8  ;;  %v717_v9 = vsel %vm113_vm4, %v708_v7, 0.0  ;;  %v723_v10 = vmul.f32 %v708_v7, %v708_v7 }
 0x90c   :  { %718 = vadd.xlane.f32.xlu1 %v717_v9  ;;  %v728_v13 = vsel %vm117_vm5, %v724_v11, 0.0 }
 0x90d   :  { %v725_v12 = vsel %vm113_vm4, %v723_v10, 0.0 }
 0x90f   :  { %726 = vadd.xlane.f32.xlu0 %v725_v12  ;;  %v1080_v12 = vld [vmem:[%s1477_s2 + $0x50] sm:$0xff] }
 0x910   :  { %729 = vadd.xlane.f32.xlu1 %v728_v13  ;;  %v1081_v13 = vld [vmem:[%s1477_s2 + $0x58] sm:$0x3f] }
 0x998   :  { %v722_v14 = vpop.xlane.xlu0 %721 }
 0x999   :  { %v719_v15 = vpop.xlane.xlu1 %718  ;;  %v732_v16 = vmul.f32 0.0625, %v722_v14 }
 0x99a   :  { %v731_v17 = vmul.f32 0.0625, %v719_v15 }
 0x99b   :  { %v736_v22 = vmul.f32 %v732_v16, %v732_v16 }
 0x99c   :  { %v735_v18 = vmul.f32 %v731_v17, %v731_v17  ;;  %v727_v19 = vpop.xlane.xlu0 %726 }
 0x99d   :  { %v733_v20 = vmul.f32 0.0625, %v727_v19  ;;  %v730_v21 = vpop.xlane.xlu1 %729 }
 0x99e   :  { %v734_v23 = vmul.f32 0.0625, %v730_v21 }
 0x99f   :  { %v737_v24 = vsub.f32 %v733_v20, %v735_v18  ;;  %v1082_v18 = vld [vmem:[%s1478_s3 + $0x50] sm:$0xff]  ;;  %v1083_v20 = vld [vmem:[%s1478_s3 + $0x58] sm:$0x3f] }
 0x9a0   :  { %v738_v25 = vsub.f32 %v734_v23, %v736_v22 }
 0x9a1   :  { %v742_v26 = vadd.f32 1e-05, %v737_v24  ;;  %v934_v24 = vld [vmem:[%s1479_s5] sm:$0xff] }
 0x9a2   :  { %v743_v27 = vadd.f32 1e-05, %v738_v25  ;;  %v935_v25 = vld [vmem:[%s1479_s5 + $0x8] sm:$0x3f] }
 0x9a3   :  { %1226 = vrsqrt.f32 %v742_v26  ;;  %v932_v26 = vld [vmem:[%s1480_s4] sm:$0xff] }
 0x9a4   :  { %1228 = vrsqrt.f32 %v743_v27  ;;  %1161 = vmatprep.mubr.msk.f32.mxu0 %vm27_vm1, %v932_v26 }
 0x9ad   :  { %v1227_v30 = vpop.eup %1226 }
 0x9ae   :  { %v1229_v31 = vpop.eup %1228  ;;  %v746_v32 = vmul.f32 %v1227_v30, %v1071_v28 }
 0x9af   :  { %v747_v33 = vmul.f32 %v1229_v31, %v1072_v29 }
 0x9b0   :  { %757 = vperm.xlu0 %1208, %v746_v32   ;;  %v751_v35 = vmul.f32 %v746_v32, %v731_v17 }
 0x9b1   :  { %762 = vperm.xlu1 %1209, %v747_v33   ;;  %v752_v37 = vmul.f32 %v747_v33, %v732_v16 }
 0x9b2   :  { %v753_v38 = vsub.f32 %v1073_v34, %v751_v35 }
 0x9b3   :  { %v754_v39 = vsub.f32 %v1074_v36, %v752_v37 }
 0x9b5   :  { %769 = vperm.xlu1 %1209, %v753_v38   ;;  %774 = vperm.xlu0 %1208, %v754_v39   ;;  %v933_v38 = vld [vmem:[%s1480_s4 + $0x8] sm:$0x3f] }
 0xa2f   :  { %v758_v41 = vpop.permute.xlu0 %757 }
 0xa30   :  { %v763_v42 = vpop.permute.xlu1 %762  ;;  %v765_v43 = vmul.f32 %v758_v41, %v708_v7 }
 0xa31   :  { %v766_v44 = vmul.f32 %v1149_v6, %v763_v42 }
 0xa34   :  { %v770_v45 = vpop.permute.xlu1 %769  ;;  %v775_v46 = vpop.permute.xlu0 %774 }
 0xa35   :  { %v777_v47 = vadd.f32 %v770_v45, %v765_v43  ;;  %v778_v48 = vadd.f32 %v775_v46, %v766_v44 }
 0xa37   :  { %v779_v49 = vmax.f32 %v777_v47, 0.0  ;;  %v780_v50 = vmax.f32 %v778_v48, 0.0 }
 0xa39   :  { %v1194_v51 = vpack.c.bf16 %v780_v50, %v779_v49 }
 0xa3b   :  { %1196 = vmatprep.subr.msk.bf16.mxu1 %vm1277_vm3, %v1194_v51 }
 0xa3c   :  { %1199 = vmatpush3.bf16.msk.msra.mxu1 %vm1277_vm3, %v1194_v51 }
 0xa3f   :  { %1155 = vmatmul.mubr.msk.f32.vlgmr.msra.gmra.mrb[4].mxu1 %vm27_vm1, %v1076_v52 }
 0xb12   :  { %v1156_v53 = vpop.f32.mrb[4].mxu1 }
 0xb13   :  { %v859_v54 = vpop.f32.mrb[5].mxu1  ;;  %v871_v55 = vsel %vm117_vm5, %v1156_v53, 0.0  ;;  %v875_v58 = vmul.f32 %v1156_v53, %v1156_v53 }
 0xb14   :  { %v874_v56 = vmul.f32 %v859_v54, %v859_v54  ;;  %872 = vadd.xlane.f32.xlu0 %v871_v55  ;;  %v868_v57 = vsel %vm113_vm4, %v859_v54, 0.0 }
 0xb15   :  { %869 = vadd.xlane.f32.xlu1 %v868_v57  ;;  %v879_v60 = vsel %vm117_vm5, %v875_v58, 0.0 }
 0xb16   :  { %v876_v59 = vsel %vm113_vm4, %v874_v56, 0.0 }
 0xb18   :  { %877 = vadd.xlane.f32.xlu0 %v876_v59 }
 0xb19   :  { %880 = vadd.xlane.f32.xlu1 %v879_v60 }
 0xba1   :  { %v873_v61 = vpop.xlane.xlu0 %872 }
 0xba2   :  { %v870_v62 = vpop.xlane.xlu1 %869  ;;  %v883_v63 = vmul.f32 0.0625, %v873_v61 }
 0xba3   :  { %v882_v0 = vmul.f32 0.0625, %v870_v62 }
 0xba4   :  { %v887_v6 = vmul.f32 %v883_v63, %v883_v63 }
 0xba5   :  { %v886_v1 = vmul.f32 %v882_v0, %v882_v0  ;;  %v878_v3 = vpop.xlane.xlu0 %877 }
 0xba6   :  { %v884_v4 = vmul.f32 0.0625, %v878_v3  ;;  %v881_v5 = vpop.xlane.xlu1 %880 }
 0xba7   :  { %v885_v7 = vmul.f32 0.0625, %v881_v5 }
 0xba8   :  { %v888_v8 = vsub.f32 %v884_v4, %v886_v1 }
 0xba9   :  { %v889_v9 = vsub.f32 %v885_v7, %v887_v6 }
 0xbaa   :  { %v893_v10 = vadd.f32 1e-05, %v888_v8 }
 0xbab   :  { %v894_v11 = vadd.f32 1e-05, %v889_v9 }
 0xbac   :  { %1230 = vrsqrt.f32 %v893_v10 }
 0xbad   :  { %1232 = vrsqrt.f32 %v894_v11 }
 0xbb6   :  { %v1231_v14 = vpop.eup %1230 }
 0xbb7   :  { %v1233_v15 = vpop.eup %1232  ;;  %v897_v16 = vmul.f32 %v1231_v14, %v1080_v12 }
 0xbb8   :  { %v898_v17 = vmul.f32 %v1233_v15, %v1081_v13 }
 0xbb9   :  { %908 = vperm.xlu0 %1208, %v897_v16   ;;  %v902_v19 = vmul.f32 %v897_v16, %v882_v0 }
 0xbba   :  { %913 = vperm.xlu1 %1209, %v898_v17   ;;  %v903_v21 = vmul.f32 %v898_v17, %v883_v63 }
 0xbbb   :  { %v904_v22 = vsub.f32 %v1082_v18, %v902_v19 }
 0xbbc   :  { %v905_v23 = vsub.f32 %v1083_v20, %v903_v21 }
 0xbbe   :  { %920 = vperm.xlu1 %1209, %v904_v22   ;;  %925 = vperm.xlu0 %1208, %v905_v23  }
 0xbc2   :  { %938 = vperm.xlu1 %1209, %v934_v24   ;;  %943 = vperm.xlu0 %1208, %v935_v25  }
 0xc38   :  { %v909_v27 = vpop.permute.xlu0 %908 }
 0xc39   :  { %v914_v28 = vpop.permute.xlu1 %913  ;;  %v916_v29 = vmul.f32 %v909_v27, %v859_v54 }
 0xc3a   :  { %v917_v30 = vmul.f32 %v1156_v53, %v914_v28 }
 0xc3d   :  { %v921_v31 = vpop.permute.xlu1 %920  ;;  %v926_v32 = vpop.permute.xlu0 %925 }
 0xc3e   :  { %v928_v33 = vadd.f32 %v921_v31, %v916_v29  ;;  %v929_v34 = vadd.f32 %v926_v32, %v917_v30 }
 0xc40   :  { %v930_v35 = vmax.f32 %v928_v33, 0.0  ;;  %v931_v36 = vmax.f32 %v929_v34, 0.0 }
 0xc41   :  { %v944_v39 = vpop.permute.xlu0 %943  ;;  %v939_v41 = vpop.permute.xlu1 %938 }
 0xc42   :  { %v1200_v37 = vpack.c.bf16 %v931_v36, %v930_v35 }
 0xc44   :  { %1202 = vmatprep.subr.msk.bf16.mxu0 %vm1277_vm3, %v1200_v37 }
 0xc45   :  { %1205 = vmatpush3.bf16.msk.msra.mxu0 %vm1277_vm3, %v1200_v37 }
 0xc48   :  { %1162 = vmatmul.mubr.msk.f32.vlgmr.msra.gmra.mrb[6].mxu0 %vm27_vm1, %v933_v38 }
 0xd1b   :  { %v1163_v40 = vpop.f32.mrb[6].mxu0 }
 0xd1c   :  { %v1027_v42 = vadd.f32 %v1163_v40, %v944_v39  ;;  %v1021_v43 = vpop.f32.mrb[7].mxu0 }
 0xd1d   :  { %v1022_v44 = vadd.f32 %v1021_v43, %v939_v41 }
 0xd1e   :  { %1031 = vst.msk [vmem:[%s1481_s6 + $0x8] sm:$0x3f] %vm117_vm5, %v1027_v42 }
 0xd1f   :  { %1030 = vst.msk [vmem:[%s1481_s6] sm:$0xff] %vm113_vm4, %v1022_v44 }

</bundles_post_ra>
